<compile_context>
chip_gen: v5e
topology: v5e:2x2
jax: 0.10.0
libtpu: 0.0.40
codegen_flags: <defaults>
</compile_context>

<pallas_src>
import math

import jax
import jax.numpy as jnp
from jax import lax
from jax.experimental import pallas as pl
from jax.experimental.pallas import tpu as pltpu

CHANNELS = 3
KERNEL_SIZE = 5
SIGMA1 = 1.0
SIGMA2 = 2.0


def _gaussian_taps(kernel_size: int, sigma: float):
    """Same construction as DoGLayer._create_gaussian_kernel, as Python floats."""
    k = kernel_size // 2
    vals = [
        [math.exp(-float(i * i + j * j) / (2.0 * sigma * sigma))
         for j in range(-k, k + 1)]
        for i in range(-k, k + 1)
    ]
    s = sum(sum(row) for row in vals)
    return [[v / s for v in row] for row in vals]


def _make_dog_kernel(w_diff, H: int, W: int, K: int):
    """Build the per-plane kernel with tap weights baked in as immediates."""
    pad = K // 2

    def kernel(x_ref, out_ref, xpad_ref):
        # x_ref    : VMEM (H, W)           -- one (b, c) plane (input dtype)
        # out_ref  : VMEM (H, W)           -- DoG output plane (input dtype)
        # xpad_ref : VMEM (H+K-1, W+K-1)   -- f32 zero-bordered scratch
        #
        # Zero the scratch unconditionally each step (robust under megacore
        # sharding of the "parallel" grid axis), then write the plane into
        # the center; the border supplies the conv's zero padding.
        xpad_ref[...] = jnp.zeros_like(xpad_ref)
        xpad_ref[pad:pad + H, pad:pad + W] = x_ref[...].astype(jnp.float32)

        # Depthwise 5x5 conv with the fused (g1 - g2) kernel:
        # 25 statically-shifted windows, each scaled by a constant tap.
        acc = jnp.zeros((H, W), jnp.float32)
        for ki in range(K):
            for kj in range(K):
                w = w_diff[ki][kj]  # Python float -> immediate
                acc = acc + w * xpad_ref[ki:ki + H, kj:kj + W]

        out_ref[...] = acc.astype(out_ref.dtype)

    return kernel


def dog_layer(x: jnp.ndarray,
              sigma1: float = SIGMA1,
              sigma2: float = SIGMA2,
              kernel_size: int = KERNEL_SIZE) -> jnp.ndarray:
    """x: (B, C, H, W) -> DoG image (B, C, H, W), same dtype as x."""
    assert x.ndim == 4
    B, C, H, W = x.shape
    N = B * C
    pad = kernel_size // 2

    g1 = _gaussian_taps(kernel_size, sigma1)
    g2 = _gaussian_taps(kernel_size, sigma2)
    # Fused difference kernel: DoG is linear, so conv(x, g1) - conv(x, g2)
    # == conv(x, g1 - g2).
    w_diff = [[g1[i][j] - g2[i][j] for j in range(kernel_size)]
              for i in range(kernel_size)]

    xr = x.reshape(N, H, W)
    kernel = _make_dog_kernel(w_diff, H, W, kernel_size)

    out = pl.pallas_call(
        kernel,
        out_shape=jax.ShapeDtypeStruct((N, H, W), x.dtype),
        grid=(N,),
        in_specs=[pl.BlockSpec((None, H, W), lambda n: (n, 0, 0))],
        out_specs=pl.BlockSpec((None, H, W), lambda n: (n, 0, 0)),
        scratch_shapes=[
            pltpu.VMEM((H + 2 * pad, W + 2 * pad), jnp.float32),
        ],
        compiler_params=pltpu.CompilerParams(
            dimension_semantics=("parallel",)),
    )(xr)
    return out.reshape(B, C, H, W)


def _dog_reference(x: jnp.ndarray) -> jnp.ndarray:
    """Pure-JAX reference using lax depthwise conv (matches PyTorch Conv2d)."""
    B, C, H, W = x.shape
    K = KERNEL_SIZE
    k = K // 2
    r = jnp.arange(-k, k + 1, dtype=jnp.float32)
    xx, yy = jnp.meshgrid(r, r, indexing="ij")

    def gauss(sigma):
        ker = jnp.exp(-(xx ** 2 + yy ** 2) / (2.0 * sigma ** 2))
        return ker / ker.sum()

    g1 = gauss(SIGMA1)
    g2 = gauss(SIGMA2)
    w1 = jnp.broadcast_to(g1, (C, 1, K, K))
    w2 = jnp.broadcast_to(g2, (C, 1, K, K))
    dn = lax.conv_dimension_numbers(x.shape, w1.shape, ("NCHW", "OIHW", "NCHW"))
    xf = x.astype(jnp.float32)
    blur1 = lax.conv_general_dilated(xf, w1, (1, 1), [(k, k), (k, k)],
                                     dimension_numbers=dn,
                                     feature_group_count=C)
    blur2 = lax.conv_general_dilated(xf, w2, (1, 1), [(k, k), (k, k)],
                                     dimension_numbers=dn,
                                     feature_group_count=C)
    return (blur1 - blur2).astype(x.dtype)


if __name__ == "__main__":
    key = jax.random.PRNGKey(0)
    B, C, H, W = 2, CHANNELS, 16, 16
    x = jax.random.normal(key, (B, C, H, W), dtype=jnp.float32)

    out = jax.block_until_ready(dog_layer(x))
    ref = jax.block_until_ready(_dog_reference(x))

    assert out.shape == (B, C, H, W)
    assert out.dtype == x.dtype
    assert jnp.allclose(out, ref, atol=1e-5, rtol=1e-5), "mismatch vs reference"

    print("KERNEL_OK")
</pallas_src>

<mosaic_0001>
module attributes {stable_mosaic.version = 11 : i64} {
  func.func @kernel(%arg0: i32, %arg1: memref<1x16x16xf32, #tpu.memory_space<vmem>>, %arg2: memref<1x16x16xf32, #tpu.memory_space<vmem>>, %arg3: memref<20x20xf32, #tpu.memory_space<vmem>>) attributes {dimension_semantics = [#tpu.dimension_semantics<parallel>], iteration_bounds = array<i64: 6>, scalar_prefetch = 0 : i64, scratch_operands = 1 : i64, tpu.core_type = #tpu.core_type<tc>, window_params = [{transform_indices = @transform_0, window_bounds = array<i64: 1, 16, 16>}, {transform_indices = @transform_1, window_bounds = array<i64: 1, 16, 16>}]} {
    %cst = arith.constant 0.000000e+00 : f32
    %0 = vector.broadcast %cst : f32 to vector<20x20xf32>
    %c0 = arith.constant 0 : index
    %c0_0 = arith.constant 0 : index
    %1 = vector.load %arg3[%c0, %c0_0] : memref<20x20xf32, #tpu.memory_space<vmem>>, vector<20x20xf32>
    tpu.vector_store %arg3[%c0, %c0_0], %0 {strides = array<i32>} : memref<20x20xf32, #tpu.memory_space<vmem>>, vector<20x20xf32>,
    %c0_1 = arith.constant 0 : index
    %c0_2 = arith.constant 0 : index
    %c0_3 = arith.constant 0 : index
    %2 = vector.load %arg1[%c0_1, %c0_2, %c0_3] : memref<1x16x16xf32, #tpu.memory_space<vmem>>, vector<1x16x16xf32>
    %3 = vector.shape_cast %2 : vector<1x16x16xf32> to vector<16x16xf32>
    %c2 = arith.constant 2 : index
    %c2_4 = arith.constant 2 : index
    %4 = vector.load %arg3[%c2, %c2_4] : memref<20x20xf32, #tpu.memory_space<vmem>>, vector<16x16xf32>
    tpu.vector_store %arg3[%c2, %c2_4], %3 {strides = array<i32>} : memref<20x20xf32, #tpu.memory_space<vmem>>, vector<16x16xf32>,
    %cst_5 = arith.constant 0.000000e+00 : f32
    %5 = vector.broadcast %cst_5 : f32 to vector<16x16xf32>
    %c0_6 = arith.constant 0 : index
    %c0_7 = arith.constant 0 : index
    %6 = vector.load %arg3[%c0_6, %c0_7] : memref<20x20xf32, #tpu.memory_space<vmem>>, vector<16x16xf32>
    %cst_8 = arith.constant -0.0202778224 : f32
    %7 = vector.broadcast %cst_8 : f32 to vector<16x16xf32>
    %8 = arith.mulf %7, %6 : vector<16x16xf32>
    %9 = arith.addf %5, %8 : vector<16x16xf32>
    %c0_9 = arith.constant 0 : index
    %c1 = arith.constant 1 : index
    %10 = vector.load %arg3[%c0_9, %c1] : memref<20x20xf32, #tpu.memory_space<vmem>>, vector<16x16xf32>
    %cst_10 = arith.constant -0.0205177423 : f32
    %11 = vector.broadcast %cst_10 : f32 to vector<16x16xf32>
    %12 = arith.mulf %11, %10 : vector<16x16xf32>
    %13 = arith.addf %9, %12 : vector<16x16xf32>
    %c0_11 = arith.constant 0 : index
    %c2_12 = arith.constant 2 : index
    %14 = vector.load %arg3[%c0_11, %c2_12] : memref<20x20xf32, #tpu.memory_space<vmem>>, vector<16x16xf32>
    %cst_13 = arith.constant -0.016389329 : f32
    %15 = vector.broadcast %cst_13 : f32 to vector<16x16xf32>
    %16 = arith.mulf %15, %14 : vector<16x16xf32>
    %17 = arith.addf %13, %16 : vector<16x16xf32>
    %c0_14 = arith.constant 0 : index
    %c3 = arith.constant 3 : index
    %18 = vector.load %arg3[%c0_14, %c3] : memref<20x20xf32, #tpu.memory_space<vmem>>, vector<16x16xf32>
    %cst_15 = arith.constant -0.0205177423 : f32
    %19 = vector.broadcast %cst_15 : f32 to vector<16x16xf32>
    %20 = arith.mulf %19, %18 : vector<16x16xf32>
    %21 = arith.addf %17, %20 : vector<16x16xf32>
    %c0_16 = arith.constant 0 : index
    %c4 = arith.constant 4 : index
    %22 = vector.load %arg3[%c0_16, %c4] : memref<20x20xf32, #tpu.memory_space<vmem>>, vector<16x16xf32>
    %cst_17 = arith.constant -0.0202778224 : f32
    %23 = vector.broadcast %cst_17 : f32 to vector<16x16xf32>
    %24 = arith.mulf %23, %22 : vector<16x16xf32>
    %25 = arith.addf %21, %24 : vector<16x16xf32>
    %c1_18 = arith.constant 1 : index
    %c0_19 = arith.constant 0 : index
    %26 = vector.load %arg3[%c1_18, %c0_19] : memref<20x20xf32, #tpu.memory_space<vmem>>, vector<16x16xf32>
    %cst_20 = arith.constant -0.0205177423 : f32
    %27 = vector.broadcast %cst_20 : f32 to vector<16x16xf32>
    %28 = arith.mulf %27, %26 : vector<16x16xf32>
    %29 = arith.addf %25, %28 : vector<16x16xf32>
    %c1_21 = arith.constant 1 : index
    %c1_22 = arith.constant 1 : index
    %30 = vector.load %arg3[%c1_21, %c1_22] : memref<20x20xf32, #tpu.memory_space<vmem>>, vector<16x16xf32>
    %cst_23 = arith.constant 0.010420735 : f32
    %31 = vector.broadcast %cst_23 : f32 to vector<16x16xf32>
    %32 = arith.mulf %31, %30 : vector<16x16xf32>
    %33 = arith.addf %29, %32 : vector<16x16xf32>
    %c1_24 = arith.constant 1 : index
    %c2_25 = arith.constant 2 : index
    %34 = vector.load %arg3[%c1_24, %c2_25] : memref<20x20xf32, #tpu.memory_space<vmem>>, vector<16x16xf32>
    %cst_26 = arith.constant 0.0425540619 : f32
    %35 = vector.broadcast %cst_26 : f32 to vector<16x16xf32>
    %36 = arith.mulf %35, %34 : vector<16x16xf32>
    %37 = arith.addf %33, %36 : vector<16x16xf32>
    %c1_27 = arith.constant 1 : index
    %c3_28 = arith.constant 3 : index
    %38 = vector.load %arg3[%c1_27, %c3_28] : memref<20x20xf32, #tpu.memory_space<vmem>>, vector<16x16xf32>
    %cst_29 = arith.constant 0.010420735 : f32
    %39 = vector.broadcast %cst_29 : f32 to vector<16x16xf32>
    %40 = arith.mulf %39, %38 : vector<16x16xf32>
    %41 = arith.addf %37, %40 : vector<16x16xf32>
    %c1_30 = arith.constant 1 : index
    %c4_31 = arith.constant 4 : index
    %42 = vector.load %arg3[%c1_30, %c4_31] : memref<20x20xf32, #tpu.memory_space<vmem>>, vector<16x16xf32>
    %cst_32 = arith.constant -0.0205177423 : f32
    %43 = vector.broadcast %cst_32 : f32 to vector<16x16xf32>
    %44 = arith.mulf %43, %42 : vector<16x16xf32>
    %45 = arith.addf %41, %44 : vector<16x16xf32>
    %c2_33 = arith.constant 2 : index
    %c0_34 = arith.constant 0 : index
    %46 = vector.load %arg3[%c2_33, %c0_34] : memref<20x20xf32, #tpu.memory_space<vmem>>, vector<16x16xf32>
    %cst_35 = arith.constant -0.016389329 : f32
    %47 = vector.broadcast %cst_35 : f32 to vector<16x16xf32>
    %48 = arith.mulf %47, %46 : vector<16x16xf32>
    %49 = arith.addf %45, %48 : vector<16x16xf32>
    %c2_36 = arith.constant 2 : index
    %c1_37 = arith.constant 1 : index
    %50 = vector.load %arg3[%c2_36, %c1_37] : memref<20x20xf32, #tpu.memory_space<vmem>>, vector<16x16xf32>
    %cst_38 = arith.constant 0.0425540619 : f32
    %51 = vector.broadcast %cst_38 : f32 to vector<16x16xf32>
    %52 = arith.mulf %51, %50 : vector<16x16xf32>
    %53 = arith.addf %49, %52 : vector<16x16xf32>
    %c2_39 = arith.constant 2 : index
    %c2_40 = arith.constant 2 : index
    %54 = vector.load %arg3[%c2_39, %c2_40] : memref<20x20xf32, #tpu.memory_space<vmem>>, vector<16x16xf32>
    %cst_41 = arith.constant 0.0989113599 : f32
    %55 = vector.broadcast %cst_41 : f32 to vector<16x16xf32>
    %56 = arith.mulf %55, %54 : vector<16x16xf32>
    %57 = arith.addf %53, %56 : vector<16x16xf32>
    %c2_42 = arith.constant 2 : index
    %c3_43 = arith.constant 3 : index
    %58 = vector.load %arg3[%c2_42, %c3_43] : memref<20x20xf32, #tpu.memory_space<vmem>>, vector<16x16xf32>
    %cst_44 = arith.constant 0.0425540619 : f32
    %59 = vector.broadcast %cst_44 : f32 to vector<16x16xf32>
    %60 = arith.mulf %59, %58 : vector<16x16xf32>
    %61 = arith.addf %57, %60 : vector<16x16xf32>
    %c2_45 = arith.constant 2 : index
    %c4_46 = arith.constant 4 : index
    %62 = vector.load %arg3[%c2_45, %c4_46] : memref<20x20xf32, #tpu.memory_space<vmem>>, vector<16x16xf32>
    %cst_47 = arith.constant -0.016389329 : f32
    %63 = vector.broadcast %cst_47 : f32 to vector<16x16xf32>
    %64 = arith.mulf %63, %62 : vector<16x16xf32>
    %65 = arith.addf %61, %64 : vector<16x16xf32>
    %c3_48 = arith.constant 3 : index
    %c0_49 = arith.constant 0 : index
    %66 = vector.load %arg3[%c3_48, %c0_49] : memref<20x20xf32, #tpu.memory_space<vmem>>, vector<16x16xf32>
    %cst_50 = arith.constant -0.0205177423 : f32
    %67 = vector.broadcast %cst_50 : f32 to vector<16x16xf32>
    %68 = arith.mulf %67, %66 : vector<16x16xf32>
    %69 = arith.addf %65, %68 : vector<16x16xf32>
    %c3_51 = arith.constant 3 : index
    %c1_52 = arith.constant 1 : index
    %70 = vector.load %arg3[%c3_51, %c1_52] : memref<20x20xf32, #tpu.memory_space<vmem>>, vector<16x16xf32>
    %cst_53 = arith.constant 0.010420735 : f32
    %71 = vector.broadcast %cst_53 : f32 to vector<16x16xf32>
    %72 = arith.mulf %71, %70 : vector<16x16xf32>
    %73 = arith.addf %69, %72 : vector<16x16xf32>
    %c3_54 = arith.constant 3 : index
    %c2_55 = arith.constant 2 : index
    %74 = vector.load %arg3[%c3_54, %c2_55] : memref<20x20xf32, #tpu.memory_space<vmem>>, vector<16x16xf32>
    %cst_56 = arith.constant 0.0425540619 : f32
    %75 = vector.broadcast %cst_56 : f32 to vector<16x16xf32>
    %76 = arith.mulf %75, %74 : vector<16x16xf32>
    %77 = arith.addf %73, %76 : vector<16x16xf32>
    %c3_57 = arith.constant 3 : index
    %c3_58 = arith.constant 3 : index
    %78 = vector.load %arg3[%c3_57, %c3_58] : memref<20x20xf32, #tpu.memory_space<vmem>>, vector<16x16xf32>
    %cst_59 = arith.constant 0.010420735 : f32
    %79 = vector.broadcast %cst_59 : f32 to vector<16x16xf32>
    %80 = arith.mulf %79, %78 : vector<16x16xf32>
    %81 = arith.addf %77, %80 : vector<16x16xf32>
    %c3_60 = arith.constant 3 : index
    %c4_61 = arith.constant 4 : index
    %82 = vector.load %arg3[%c3_60, %c4_61] : memref<20x20xf32, #tpu.memory_space<vmem>>, vector<16x16xf32>
    %cst_62 = arith.constant -0.0205177423 : f32
    %83 = vector.broadcast %cst_62 : f32 to vector<16x16xf32>
    %84 = arith.mulf %83, %82 : vector<16x16xf32>
    %85 = arith.addf %81, %84 : vector<16x16xf32>
    %c4_63 = arith.constant 4 : index
    %c0_64 = arith.constant 0 : index
    %86 = vector.load %arg3[%c4_63, %c0_64] : memref<20x20xf32, #tpu.memory_space<vmem>>, vector<16x16xf32>
    %cst_65 = arith.constant -0.0202778224 : f32
    %87 = vector.broadcast %cst_65 : f32 to vector<16x16xf32>
    %88 = arith.mulf %87, %86 : vector<16x16xf32>
    %89 = arith.addf %85, %88 : vector<16x16xf32>
    %c4_66 = arith.constant 4 : index
    %c1_67 = arith.constant 1 : index
    %90 = vector.load %arg3[%c4_66, %c1_67] : memref<20x20xf32, #tpu.memory_space<vmem>>, vector<16x16xf32>
    %cst_68 = arith.constant -0.0205177423 : f32
    %91 = vector.broadcast %cst_68 : f32 to vector<16x16xf32>
    %92 = arith.mulf %91, %90 : vector<16x16xf32>
    %93 = arith.addf %89, %92 : vector<16x16xf32>
    %c4_69 = arith.constant 4 : index
    %c2_70 = arith.constant 2 : index
    %94 = vector.load %arg3[%c4_69, %c2_70] : memref<20x20xf32, #tpu.memory_space<vmem>>, vector<16x16xf32>
    %cst_71 = arith.constant -0.016389329 : f32
    %95 = vector.broadcast %cst_71 : f32 to vector<16x16xf32>
    %96 = arith.mulf %95, %94 : vector<16x16xf32>
    %97 = arith.addf %93, %96 : vector<16x16xf32>
    %c4_72 = arith.constant 4 : index
    %c3_73 = arith.constant 3 : index
    %98 = vector.load %arg3[%c4_72, %c3_73] : memref<20x20xf32, #tpu.memory_space<vmem>>, vector<16x16xf32>
    %cst_74 = arith.constant -0.0205177423 : f32
    %99 = vector.broadcast %cst_74 : f32 to vector<16x16xf32>
    %100 = arith.mulf %99, %98 : vector<16x16xf32>
    %101 = arith.addf %97, %100 : vector<16x16xf32>
    %c4_75 = arith.constant 4 : index
    %c4_76 = arith.constant 4 : index
    %102 = vector.load %arg3[%c4_75, %c4_76] : memref<20x20xf32, #tpu.memory_space<vmem>>, vector<16x16xf32>
    %cst_77 = arith.constant -0.0202778224 : f32
    %103 = vector.broadcast %cst_77 : f32 to vector<16x16xf32>
    %104 = arith.mulf %103, %102 : vector<16x16xf32>
    %105 = arith.addf %101, %104 : vector<16x16xf32>
    %c0_78 = arith.constant 0 : index
    %c0_79 = arith.constant 0 : index
    %c0_80 = arith.constant 0 : index
    %106 = vector.load %arg2[%c0_78, %c0_79, %c0_80] : memref<1x16x16xf32, #tpu.memory_space<vmem>>, vector<1x16x16xf32>
    %107 = vector.shape_cast %106 : vector<1x16x16xf32> to vector<16x16xf32>
    %108 = vector.shape_cast %105 : vector<16x16xf32> to vector<1x16x16xf32>
    tpu.vector_store %arg2[%c0_78, %c0_79, %c0_80], %108 {strides = array<i32>} : memref<1x16x16xf32, #tpu.memory_space<vmem>>, vector<1x16x16xf32>,
    return
  }
  func.func @transform_0(%arg0: i32) -> (i32, i32, i32) {
    %c0_i32 = arith.constant 0 : i32
    %c0_i32_0 = arith.constant 0 : i32
    %c0_i32_1 = arith.constant 0 : i32
    return %arg0, %c0_i32, %c0_i32_0 : i32, i32, i32
  }
  func.func @transform_1(%arg0: i32) -> (i32, i32, i32) {
    %c0_i32 = arith.constant 0 : i32
    %c0_i32_0 = arith.constant 0 : i32
    %c0_i32_1 = arith.constant 0 : i32
    return %arg0, %c0_i32, %c0_i32_0 : i32, i32, i32
  }
}

</mosaic_0001>

<bundles_post_ra>
// kernel: tpu_custom_call.1
= control target key start
LH: loop header
LB: loop body
LE: loop exit
PB: predicated region body
PF: predicated region fallthrough
CT: control target
= control target key end

     0   :  { %6 = vsyncpa [#allocation4], 0  ;;  %s886_s0 = inlined_call_operand.hbm [shape: f32[6,16,16], index: 0, kind: input, shape index: {}]   ;;  %s887_s1 = inlined_call_operand.hbm [shape: f32[6,16,16], index: 1, kind: output, shape index: {}]  }
   0x1   :  { %8 = vsyncpa [#allocation4 + $0x1], 0 }
   0x2   :  { %9 = vsyncpa [#allocation5], 0 }
   0x3   :  { %11 = vsyncpa [#allocation5 + $0x1], 0  ;;  %s677_s6 = smov 0   ;;  %s679_s7 = smov 0  }
   0x4   :  { %s681_s8 = smov 0   ;;  %s683_s9 = smov 0  }
   0x5 LB: > { %s698_s10 = sadd.s32 4294967295, %s655_s9   ;;  %s487_s11 = sadd.s32 4294967294, %s655_s9   ;;  %s655_s9 = sphi %s683_s9, %s896_s9   ;;  %s651_s8 = sphi %s681_s8, %s895_s8   ;;  %s647_s7 = sphi %s679_s7, %s894_s7   ;;  %s643_s6 = sphi %s677_s6, %s893_s6  }
   0x6   : > { %s702_s12 = sadd.s32 1, %s655_s9   ;;  %s24_s13 = sadd.s32 1, %s651_s8 }
   0x7   : > { %s21_s14 = ssub.s32 %s655_s9, %s702_s12  ;;  %p31_p0 = scmp.ne.s32.totalorder %s651_s8, %s647_s7 }
   0x8   : > { %p22_p1 = scmp.eq.s32.totalorder %s21_s14, 0  ;;  %p32_p2 = scmp.eq.s32.totalorder %s655_s9, 0 }
   0x9   : > { %p37_p3 = scmp.ne.s32.totalorder %s647_s7, %s643_s6  ;;  %p38_p4 = scmp.eq.s32.totalorder %s698_s10, 0 }
   0xa   : > { %s714_s15 = scalar_select %p22_p1, %s651_s8, %s24_s13  }
   0xb   : > { %p716_p5 = por %p32_p2, %p31_p0  ;;  %p720_p6 = por %p38_p4, %p37_p3 }
   0xc   : > { %p61_p7 = scmp.eq.s32.totalorder %s698_s10, 5  ;;  %p67_p8 = scmp.eq.s32.totalorder %s487_s11, 5 }
   0xd   : > { %p515_p9 = scmp.lt.s32.totalorder %s655_s9, 6  ;;  %s87_s20 = sand.u32 1, %s651_s8  }
   0xe   : > { %p726_p10 = por %p61_p7, %p31_p0  ;;  %p730_p11 = por %p67_p8, %p37_p3 }
   0xf   : > { %s501_s21 = sshll.u32 %s655_s9, 4  ;;  %s490_s22 = sshll.u32 %s87_s20, 4 }
  0x10   : > { %s96_s25 = scalar_lea.hbm %s886_s0, %s501_s21  ;;  %s91_s27 = scalar_lea.vmem [#allocation3], %s490_s22 }
  0x11   : > { %s97_s26 = sshll.u32 %s96_s25, 4  ;;  %s99_s28 = sshll.u32 %s91_s27, 4  ;;  %s98_s26 = int_to_ptr.hbm [resolvable:$true] %s97_s26  ;;  %s100_s28 = int_to_ptr.vmem [resolvable:$true] %s99_s28 }
  0x12   : > { %p741_p12 = pnand %p515_p9, %p716_p5  ;;  %p493_p13 = scmp.ge.s32.totalorder %s655_s9, 1 }
  0x13   : > { %p107_p0 = scmp.lt.s32.totalorder %s655_s9, 7  ;;  %s88_s30 = scalar_lea.sflag [#allocation4], %s87_s20 }
  0x14   : > { %s559_s2 = sshra.s32 %s98_s26, 4  ;;  %p563_p2 = pneg %p741_p12  ;;  %s560_s2 = int_to_ptr.hbm [resolvable:$true] %s559_s2 }
  0x15   : > { %s561_s3 = scalar_lea.hbm %s560_s2, 16  ;;  %s566_s11 = scalar_lea.hbm %s886_s0, 96 }
  0x16   : > { %p562_p1 = scmp.ne.s32.totalorder %s560_s2, %s561_s3  ;;  %p567_p5 = scmp.lt.s32.totalorder %s560_s2, %s886_s0 }
  0x17   : > { %p568_p7 = scmp.lt.s32.totalorder %s566_s11, %s561_s3 }
  0x18   : > { %p564_p3 = pnand %p563_p2, %p562_p1 }
  0x19   : > { %p569_p8 = por %p568_p7, %p567_p5 }
  0x1a   : > { %p565_p4 = pneg %p564_p3 }
  0x1c   : > { %p570_p9 = pnand %p569_p8, %p565_p4 }
  0x1e   : > { %573 = shalt.err (!%p570_p9)
}
  0x1f   : > { %s657_s16 = smov 128   ;;  %s658_s20 = smov 8  }
  0x20   : > { %510 = dma.hbm_to_vmem [thread:$0]  (!%p741_p12), %s98_s26, 256, %s100_s28, %s88_s30, %s657_s16, %s657_s16, %s658_s20  }
  0x21   : > { %p108_p1 = pnand %p493_p13, %p107_p0 }
  0x22   : > { %s762_s21 = sand.u32 (!%p108_p1), 1, %s647_s7  }
  0x23   : > { %111 = sbr.rel (%p108_p1) target bundleno = 393 (0x189), region = 24  ;;  %s494_s22 = sshll.u32 (!%p108_p1), %s762_s21, 4 }
  0x24   : > { %s114_s23 = scalar_lea.sflag (!%p108_p1), [#allocation4], %s762_s21  ;;  %s117_s24 = scalar_lea.vmem (!%p108_p1), [#allocation3], %s494_s22 }
  0x28   : > { %634 = dma.done.wait (%p720_p6), %s114_s23, 256  }
  0x29   : > { %636 = vsyncadd (%p720_p6), %s114_s23, 4294967040  ;;  %vm137_vm0 = vcmask 162816   ;;  %v659_v0 = vmov 0.0   ;;  %v142_v1 = vld [vmem:[%s117_s24] sm:$0xff]  ;;  %s660_s25 = smov 2   ;;  %v143_v2 = vld [vmem:[%s117_s24 + $0x8] sm:$0xff] }
  0x2a   : > { %138 = vst.msk [vmem:[#allocation2] sm:$0xff] %vm137_vm0, %v659_v0  ;;  %146 = vrot.lane.b32.xlu0 %v142_v1, %s660_s25  ;;  %vm140_vm1 = vcmask 158720   ;;  %vm152_vm2 = vcmask 146448   ;;  %s661_s17 = smov 126   ;;  %s662_s26 = smov 125   ;;  %vm395_vm3 = vcmask 130048  }
  0x2b   : > { %139 = vst.msk [vmem:[#allocation2 + $0x8] sm:$0xff] %vm137_vm0, %v659_v0  ;;  %s663_s27 = smov 127   ;;  %s664_s28 = smov 124  }
  0x2c   : > { %141 = vst.msk [vmem:[#allocation2 + $0x10] sm:$0xf] %vm140_vm1, %v659_v0  ;;  %s502_s29 = sshll.u32 %s698_s10, 4  ;;  %s136_s4 = scalar_lea.vmem [#allocation6], %s494_s22 }
  0x2d   : > { %s410_s3 = scalar_lea.hbm %s887_s1, %s502_s29  ;;  %s411_s5 = sshll.u32 %s136_s4, 4  ;;  %s412_s5 = int_to_ptr.vmem [resolvable:$true] %s411_s5 }
  0x2e   : > { %s413_s11 = sshll.u32 %s410_s3, 4  ;;  %s399_s10 = scalar_lea.sflag [#allocation5], %s762_s21  ;;  %s414_s11 = int_to_ptr.hbm [resolvable:$true] %s413_s11 }
  0x2f   : > { %s603_s13 = sshra.s32 %s414_s11, 4  ;;  %s609_s22 = scalar_lea.hbm %s887_s1, 96  ;;  %s604_s13 = int_to_ptr.hbm [resolvable:$true] %s603_s13 }
  0x30   : > { %s605_s14 = scalar_lea.hbm %s604_s13, 16  ;;  %p610_p0 = scmp.lt.s32.totalorder %s604_s13, %s887_s1 }
  0x31   : > { %p606_p6 = scmp.ne.s32.totalorder %s604_s13, %s605_s14  ;;  %p611_p2 = scmp.lt.s32.totalorder %s609_s22, %s605_s14 }
  0x32   : > { %148 = vrot.lane.b32.xlu0 %v143_v2, %s660_s25 }
  0x33   : > { %p607_p12 = pnand %p606_p6, %p726_p10  ;;  %p612_p3 = por %p611_p2, %p610_p0 }
  0x35   : > { %p608_p13 = pneg %p607_p12 }
  0x37   : > { %p613_p4 = pnand %p612_p3, %p608_p13 }
  0x9c   : > { %v147_v3 = vpop.permute.xlu0 %146 }
  0x9d   : > { %153 = vst.msk [vmem:[#allocation2 + $0x2] sm:$0xff] %vm152_vm2, %v147_v3 }
  0xa4   : > { %v149_v4 = vpop.permute.xlu0 %148  ;;  %v155_v5 = vld [vmem:[#allocation2] sm:$0xff] }
  0xa5   : > { %154 = vst.msk [vmem:[#allocation2 + $0xa] sm:$0xff] %vm152_vm2, %v149_v4  ;;  %v173_v6 = vmul.f32 -0.016389329, %v155_v5  ;;  %v161_v7 = vmul.f32 -0.020517742, %v155_v5  ;;  %v203_v12 = vld [vmem:[#allocation2 + $0x1] sm:$0xff] }
  0xa6   : > { %v221_v13 = vmul.f32 0.04255406, %v203_v12  ;;  %v781_v14 = vmul.f32 -0.020277822, %v155_v5  ;;  %v209_v17 = vmul.f32 0.010420735, %v203_v12 }
  0xa7   : > { %177 = vrot.lane.b32.xlu2 %v173_v6, %s661_s17  ;;  %185 = vrot.lane.b32.xlu0 %v161_v7, %s662_s26  ;;  %v251_v18 = vld [vmem:[#allocation2 + $0x2] sm:$0xff]  ;;  %v795_v24 = vmul.f32 -0.020517742, %v203_v12 }
  0xa8   : > { %165 = vrot.lane.b32.xlu1 %v161_v7, %s663_s27  ;;  %v257_v19 = vmul.f32 0.04255406, %v251_v18  ;;  %v802_v25 = vmul.f32 -0.016389329, %v251_v18  ;;  %v269_v26 = vmul.f32 0.09891136, %v251_v18 }
  0xac   : > { %v156_v8 = vld [vmem:[#allocation2 + $0x8] sm:$0xff] }
  0xad   : > { %v174_v9 = vmul.f32 -0.016389329, %v156_v8  ;;  %v775_v10 = vmul.f32 -0.020277822, %v156_v8  ;;  %v162_v11 = vmul.f32 -0.020517742, %v156_v8 }
  0xae   : > { %v204_v15 = vld [vmem:[#allocation2 + $0x9] sm:$0xff] }
  0xaf   : > { %179 = vrot.lane.b32.xlu2 %v174_v9, %s661_s17  ;;  %197 = vrot.lane.b32.xlu0 %v775_v10, %s664_s28  ;;  %v210_v16 = vmul.f32 0.010420735, %v204_v15  ;;  %v222_v20 = vmul.f32 0.04255406, %v204_v15  ;;  %v252_v21 = vld [vmem:[#allocation2 + $0xa] sm:$0xff] }
  0xb0   : > { %167 = vrot.lane.b32.xlu1 %v162_v11, %s663_s27  ;;  %v270_v22 = vmul.f32 0.09891136, %v252_v21  ;;  %v793_v23 = vmul.f32 -0.020517742, %v204_v15  ;;  %v258_v27 = vmul.f32 0.04255406, %v252_v21 }
  0xb1   : > { %v300_v28 = vld [vmem:[#allocation2 + $0xb] sm:$0xff]  ;;  %v299_v30 = vld [vmem:[#allocation2 + $0x3] sm:$0xff]  ;;  %v811_v32 = vmul.f32 -0.016389329, %v252_v21 }
  0xb2   : > { %v306_v29 = vmul.f32 0.010420735, %v300_v28  ;;  %v305_v31 = vmul.f32 0.010420735, %v299_v30  ;;  %v817_v33 = vmul.f32 -0.020517742, %v300_v28 }
  0xb3   : > { %v318_v34 = vmul.f32 0.04255406, %v300_v28  ;;  %v317_v35 = vmul.f32 0.04255406, %v299_v30  ;;  %v347_v36 = vld [vmem:[#allocation2 + $0x4] sm:$0xff]  ;;  %v348_v39 = vld [vmem:[#allocation2 + $0xc] sm:$0xff] }
  0xb4   : > { %v365_v37 = vmul.f32 -0.016389329, %v347_v36  ;;  %v823_v38 = vmul.f32 -0.020517742, %v299_v30  ;;  %v354_v40 = vmul.f32 -0.020517742, %v348_v39 }
  0xb5   : > { %v353_v41 = vmul.f32 -0.020517742, %v347_v36  ;;  %v366_v43 = vmul.f32 -0.016389329, %v348_v39  ;;  %v834_v45 = vmul.f32 -0.020277822, %v348_v39 }
  0xb6   : > { %v836_v46 = vmul.f32 -0.020277822, %v347_v36 }
  0xb7   : > { %225 = vrot.lane.b32.xlu0 %v221_v13, %s661_s17  ;;  %195 = vrot.lane.b32.xlu2 %v781_v14, %s664_s28 }
  0xb8   : > { %187 = vrot.lane.b32.xlu1 %v162_v11, %s662_s26 }
  0xbf   : > { %235 = vrot.lane.b32.xlu0 %v210_v16, %s662_s26  ;;  %215 = vrot.lane.b32.xlu2 %v210_v16, %s663_s27 }
  0xc0   : > { %213 = vrot.lane.b32.xlu1 %v209_v17, %s663_s27 }
  0xc7   : > { %261 = vrot.lane.b32.xlu0 %v257_v19, %s663_s27  ;;  %233 = vrot.lane.b32.xlu2 %v209_v17, %s662_s26 }
  0xc8   : > { %227 = vrot.lane.b32.xlu1 %v222_v20, %s661_s17 }
  0xcf   : > { %275 = vrot.lane.b32.xlu0 %v270_v22, %s661_s17  ;;  %245 = vrot.lane.b32.xlu2 %v793_v23, %s664_s28 }
  0xd0   : > { %243 = vrot.lane.b32.xlu1 %v795_v24, %s664_s28 }
  0xd7   : > { %291 = vrot.lane.b32.xlu0 %v802_v25, %s664_s28  ;;  %273 = vrot.lane.b32.xlu2 %v269_v26, %s661_s17 }
  0xd8   : > { %263 = vrot.lane.b32.xlu1 %v258_v27, %s663_s27 }
  0xdf   : > { %311 = vrot.lane.b32.xlu0 %v306_v29, %s663_s27  ;;  %283 = vrot.lane.b32.xlu2 %v258_v27, %s662_s26 }
  0xe0   : > { %281 = vrot.lane.b32.xlu1 %v257_v19, %s662_s26 }
  0xe7   : > { %329 = vrot.lane.b32.xlu0 %v305_v31, %s662_s26  ;;  %309 = vrot.lane.b32.xlu2 %v305_v31, %s663_s27 }
  0xe8   : > { %293 = vrot.lane.b32.xlu1 %v811_v32, %s664_s28 }
  0xef   : > { %341 = vrot.lane.b32.xlu0 %v817_v33, %s664_s28  ;;  %323 = vrot.lane.b32.xlu2 %v318_v34, %s661_s17 }
  0xf0   : > { %321 = vrot.lane.b32.xlu1 %v317_v35, %s661_s17 }
  0xf7   : > { %369 = vrot.lane.b32.xlu0 %v365_v37, %s661_s17  ;;  %339 = vrot.lane.b32.xlu2 %v823_v38, %s664_s28 }
  0xf8   : > { %331 = vrot.lane.b32.xlu1 %v306_v29, %s662_s26 }
  0xff   : > { %379 = vrot.lane.b32.xlu0 %v354_v40, %s662_s26  ;;  %359 = vrot.lane.b32.xlu2 %v354_v40, %s663_s27 }
 0x100   : > { %357 = vrot.lane.b32.xlu1 %v353_v41, %s663_s27 }
 0x101   : > { %v178_v42 = vpop.permute.xlu2 %177 }
 0x107   : > { %377 = vrot.lane.b32.xlu2 %v353_v41, %s662_s26 }
 0x108   : > { %371 = vrot.lane.b32.xlu1 %v366_v43, %s661_s17 }
 0x109   : > { %v180_v44 = vpop.permute.xlu2 %179 }
 0x10f   : > { %389 = vrot.lane.b32.xlu2 %v834_v45, %s664_s28 }
 0x110   : > { %387 = vrot.lane.b32.xlu1 %v836_v46, %s664_s28 }
 0x111   : > { %v196_v47 = vpop.permute.xlu2 %195 }
 0x119   : > { %v186_v48 = vpop.permute.xlu0 %185  ;;  %v216_v50 = vpop.permute.xlu2 %215 }
 0x11a   : > { %v166_v49 = vpop.permute.xlu1 %165 }
 0x11b   : > { %v171_v59 = vadd.f32 %v166_v49, %v781_v14 }
 0x11d   : > { %v183_v61 = vadd.f32 %v178_v42, %v171_v59 }
 0x11f   : > { %v191_v3 = vadd.f32 %v186_v48, %v183_v61 }
 0x121   : > { %v198_v51 = vpop.permute.xlu0 %197  ;;  %v234_v53 = vpop.permute.xlu2 %233  ;;  %v201_v5 = vadd.f32 %v196_v47, %v191_v3 }
 0x122   : > { %v168_v52 = vpop.permute.xlu1 %167 }
 0x123   : > { %v172_v60 = vadd.f32 %v168_v52, %v775_v10  ;;  %v207_v11 = vadd.f32 %v795_v24, %v201_v5 }
 0x125   : > { %v184_v62 = vadd.f32 %v180_v44, %v172_v60 }
 0x129   : > { %v226_v54 = vpop.permute.xlu0 %225  ;;  %v246_v56 = vpop.permute.xlu2 %245 }
 0x12a   : > { %v188_v55 = vpop.permute.xlu1 %187 }
 0x12b   : > { %v192_v0 = vadd.f32 %v188_v55, %v184_v62 }
 0x12d   : > { %v202_v4 = vadd.f32 %v198_v51, %v192_v0 }
 0x12f   : > { %v208_v6 = vadd.f32 %v793_v23, %v202_v4 }
 0x131   : > { %v236_v57 = vpop.permute.xlu0 %235  ;;  %v274_v63 = vpop.permute.xlu2 %273  ;;  %v220_v13 = vadd.f32 %v216_v50, %v208_v6 }
 0x132   : > { %v214_v58 = vpop.permute.xlu1 %213 }
 0x133   : > { %v219_v12 = vadd.f32 %v214_v58, %v207_v11 }
 0x135   : > { %v231_v10 = vadd.f32 %v226_v54, %v219_v12 }
 0x137   : > { %v239_v19 = vadd.f32 %v234_v53, %v231_v10 }
 0x139   : > { %v262_v1 = vpop.permute.xlu0 %261  ;;  %v284_v8 = vpop.permute.xlu2 %283 }
 0x13a   : > { %v228_v2 = vpop.permute.xlu1 %227 }
 0x13b   : > { %v232_v14 = vadd.f32 %v228_v2, %v220_v13 }
 0x13d   : > { %v240_v17 = vadd.f32 %v236_v57, %v232_v14 }
 0x13f   : > { %v250_v21 = vadd.f32 %v246_v56, %v240_v17 }
 0x141   : > { %v276_v7 = vpop.permute.xlu0 %275  ;;  %v310_v18 = vpop.permute.xlu2 %309  ;;  %v256_v23 = vadd.f32 %v811_v32, %v250_v21 }
 0x142   : > { %v244_v9 = vpop.permute.xlu1 %243 }
 0x143   : > { %v249_v20 = vadd.f32 %v244_v9, %v239_v19 }
 0x145   : > { %v255_v26 = vadd.f32 %v802_v25, %v249_v20 }
 0x147   : > { %v267_v24 = vadd.f32 %v262_v1, %v255_v26 }
 0x149   : > { %v292_v15 = vpop.permute.xlu0 %291  ;;  %v324_v29 = vpop.permute.xlu2 %323  ;;  %v279_v34 = vadd.f32 %v274_v63, %v267_v24 }
 0x14a   : > { %v264_v16 = vpop.permute.xlu1 %263 }
 0x14b   : > { %v268_v28 = vadd.f32 %v264_v16, %v256_v23 }
 0x14d   : > { %v280_v30 = vadd.f32 %v276_v7, %v268_v28 }
 0x14f   : > { %v288_v36 = vadd.f32 %v284_v8, %v280_v30 }
 0x151   : > { %v312_v27 = vpop.permute.xlu0 %311  ;;  %v340_v40 = vpop.permute.xlu2 %339 }
 0x152   : > { %v282_v22 = vpop.permute.xlu1 %281 }
 0x153   : > { %v287_v35 = vadd.f32 %v282_v22, %v279_v34 }
 0x155   : > { %v297_v41 = vadd.f32 %v292_v15, %v287_v35 }
 0x157   : > { %v303_v25 = vadd.f32 %v823_v38, %v297_v41 }
 0x159   : > { %v330_v37 = vpop.permute.xlu0 %329  ;;  %v315_v47 = vadd.f32 %v310_v18, %v303_v25  ;;  %v360_v48 = vpop.permute.xlu2 %359 }
 0x15a   : > { %v294_v31 = vpop.permute.xlu1 %293 }
 0x15b   : > { %v298_v39 = vadd.f32 %v294_v31, %v288_v36 }
 0x15d   : > { %v304_v43 = vadd.f32 %v817_v33, %v298_v39 }
 0x15f   : > { %v316_v44 = vadd.f32 %v312_v27, %v304_v43 }
 0x161   : > { %v342_v32 = vpop.permute.xlu0 %341  ;;  %v328_v51 = vadd.f32 %v324_v29, %v316_v44  ;;  %v378_v58 = vpop.permute.xlu2 %377 }
 0x162   : > { %v322_v42 = vpop.permute.xlu1 %321 }
 0x163   : > { %v327_v50 = vadd.f32 %v322_v42, %v315_v47 }
 0x165   : > { %v335_v53 = vadd.f32 %v330_v37, %v327_v50 }
 0x167   : > { %v345_v57 = vadd.f32 %v340_v40, %v335_v53 }
 0x169   : > { %v370_v55 = vpop.permute.xlu0 %369  ;;  %v351_v38 = vadd.f32 %v836_v46, %v345_v57  ;;  %v390_v2 = vpop.permute.xlu2 %389 }
 0x16a   : > { %v332_v49 = vpop.permute.xlu1 %331 }
 0x16b   : > { %v336_v52 = vadd.f32 %v332_v49, %v328_v51 }
 0x16d   : > { %v346_v54 = vadd.f32 %v342_v32, %v336_v52 }
 0x16f   : > { %v352_v33 = vadd.f32 %v834_v45, %v346_v54 }
 0x171   : > { %v364_v60 = vadd.f32 %v360_v48, %v352_v33  ;;  %v380_v63 = vpop.permute.xlu0 %379 }
 0x172   : > { %v358_v56 = vpop.permute.xlu1 %357 }
 0x173   : > { %v363_v59 = vadd.f32 %v358_v56, %v351_v38 }
 0x175   : > { %v375_v0 = vadd.f32 %v370_v55, %v363_v59 }
 0x177   : > { %v383_v45 = vadd.f32 %v378_v58, %v375_v0 }
 0x17a   : > { %v372_v61 = vpop.permute.xlu1 %371 }
 0x17b   : > { %v376_v62 = vadd.f32 %v372_v61, %v364_v60 }
 0x17d   : > { %v384_v1 = vadd.f32 %v380_v63, %v376_v62 }
 0x17f   : > { %v394_v3 = vadd.f32 %v390_v2, %v384_v1 }
 0x181   : > { %397 = vst.msk [vmem:[%s136_s4 + $0x8] sm:$0xff] %vm395_vm3, %v394_v3 }
 0x182   : > { %v388_v46 = vpop.permute.xlu1 %387 }
 0x183   : > { %v393_v4 = vadd.f32 %v388_v46, %v383_v45 }
 0x185   : > { %396 = vst.msk [vmem:[%s136_s4] sm:$0xff] %vm395_vm3, %v393_v4 }
 0x186   : > { %616 = shalt.err (!%p613_p4)
}
 0x187   : > { %s665_s21 = smov 128   ;;  %s666_s25 = smov 8  }
 0x188   : > { %505 = dma.vmem_to_hbm [thread:$0]  (%p726_p10), %s412_s5, 256, %s414_s11, %s399_s10, %s665_s21, %s665_s21, %s666_s25  }
 0x189 PF: > { %p516_p5 = scmp.ge.s32.totalorder %s655_s9, 2  ;;  %s428_s17 = sand.u32 1, %s643_s6  }
 0x18a   : > { %s429_s26 = scalar_lea.sflag [#allocation5], %s428_s17 }
 0x18b   : > { %p512_p7 = pnand %p516_p5, %p730_p11 }
 0x18d   : > { %p513_p8 = pneg %p512_p7 }
 0x18f   : > { %638 = dma.done.wait (%p513_p8), %s429_s26, 256  }
 0x190   : > { %640 = vsyncadd (%p513_p8), %s429_s26, 4294967040  ;;  %p14_p9 = scmp.ge.s32.totalorder %s702_s12, 8   ;;  %s893_s6 = smov %s647_s7 }
 0x191   : > { %s894_s7 = smov %s651_s8  ;;  %s895_s8 = smov %s714_s15 }
 0x192   : > { %s896_s9 = smov %s702_s12  ;;  %16 = sbr.rel (!%p14_p9) target bundleno = 5 (0x5), region = 69 }
 0x197   :  { %435 = vsyncpa [#allocation4], 1 }
 0x198   :  { %437 = vsyncpa [#allocation4 + $0x1], 1 }
 0x199   :  { %438 = vsyncpa [#allocation5], 1 }
 0x19a   :  { %440 = vsyncpa [#allocation5 + $0x1], 1 }

</bundles_post_ra>
